<compile_context>
chip_gen: v6e
topology: v6e:2x2x1
jax: 0.10.0
libtpu: 0.0.40
codegen_flags: <defaults>
</compile_context>

<pallas_src>
import functools

import jax
import jax.numpy as jnp
from jax.experimental import pallas as pl
from jax.experimental.pallas import tpu as pltpu

_LANE = 128
_SUBLANE = 8
_TM_CAP = 512          # >=512-row tiles reach ~85% of HBM roofline vs ~63% at 256


def _round_up(x, m):
    return (x + m - 1) // m * m


def _batch_tile(M):
    """~half the batch (>=2 grid steps when possible so v7x megacore shards the
    'parallel' axis across both TensorCores), 8-row aligned, capped at 512."""
    tm = _round_up(max(1, -(-M // 2)), _SUBLANE)
    tm = min(tm, _TM_CAP, _round_up(M, _SUBLANE))
    return max(tm, _SUBLANE)


# ----------------------------- fused kernel ---------------------------------

def _mlp_softmax_kernel(x_ref, *refs, n_layers, n_classes, activation):
    """refs = (w_0, b_0, w_1, b_1, ..., w_{L-1}, b_{L-1}, o_ref).

    x_ref : (tm, D_in)   f32 tile of the raw (un-padded) batch.
    w_i   : (K_i, N_i_pad) f32, output dim zero-padded to 128 lanes.
    b_i   : (1, N_i_pad)   f32, zero-padded.
    o_ref : (tm, n_classes) f32 softmax probabilities.
    """
    o_ref = refs[-1]

    h = x_ref[...]                                        # f32
    for layer in range(n_layers):
        w = refs[2 * layer][...]                          # (K, N_pad) f32
        b = refs[2 * layer + 1][...]                      # (1, N_pad) f32
        # f32 MXU matmul with f32 accumulation (closer to the f64 reference
        # than bf16 operands).  Padded weight cols / bias lanes are zero, so
        # padded activation lanes stay exactly 0 through every layer.
        h = jnp.dot(h, w, preferred_element_type=jnp.float32) + b
        # Reference applies the activation after EVERY layer (incl. the last).
        h = activation(h)

    # Numerically stable softmax over the real class lanes only: slice first,
    # so no -inf masking / extra vselects are needed.
    logits = h[:, :n_classes]
    m = jnp.max(logits, axis=1, keepdims=True)
    e = jnp.exp(logits - m)
    denom = jnp.sum(e, axis=1, keepdims=True)
    o_ref[...] = (e / denom).astype(o_ref.dtype)          # exact divide (cheap: (tm,1))


# ----------------------------- model wrapper --------------------------------

class PTDeepPallas:
    """JAX/Pallas re-implementation of PTDeep.forward (default activation: ReLU)."""

    def __init__(self, sizes, key, activation=None):
        self.sizes = list(sizes)
        self.n_classes = sizes[-1]
        self.activation = activation if activation is not None else (
            lambda h: jnp.maximum(h, 0.0))

        # Weight i maps sizes[i-1] -> sizes[i].  Only the *output* (lane) dim is
        # zero-padded to a multiple of 128 so every matmul result is lane-dense;
        # the contraction dim of the FIRST weight stays at the true input width
        # so the kernel can consume the un-padded batch directly (Mosaic masks
        # the ragged contraction).  Deeper weights pad K to the previous layer's
        # padded width; the extra rows are zero so they contribute nothing.
        self.weights = []   # f32, (K, N_pad)
        self.biases = []    # f32, (1, N_pad)
        for i in range(1, len(sizes)):
            key, sub = jax.random.split(key)
            # torch: nn.Parameter(torch.randn(sizes[i-1], sizes[i]))
            w = jax.random.normal(sub, (sizes[i - 1], sizes[i]), dtype=jnp.float32)
            # torch: nn.Parameter(torch.zeros([sizes[i]]))
            b = jnp.zeros((sizes[i],), dtype=jnp.float32)

            kp = sizes[0] if i == 1 else _round_up(sizes[i - 1], _LANE)
            np_ = _round_up(sizes[i], _LANE)
            w_pad = jnp.zeros((kp, np_), jnp.float32).at[:sizes[i - 1], :sizes[i]].set(w)
            b_pad = jnp.zeros((1, np_), jnp.float32).at[0, :sizes[i]].set(b)
            self.weights.append(w_pad)
            self.biases.append(b_pad)

    @staticmethod
    def _const_spec(shape, single_buffer):
        # Constant operand (same block every grid step).  Single-buffering halves
        # its resident VMEM; default pipelining double-buffers even invariant blocks.
        if single_buffer:
            return pl.BlockSpec(shape, lambda i: (0, 0), pipeline_mode=pl.Buffered(1))
        return pl.BlockSpec(shape, lambda i: (0, 0))

    def forward(self, x):
        x = jnp.asarray(x, jnp.float32)
        M, K0 = x.shape
        assert K0 == self.sizes[0]

        tm = _batch_tile(M)
        grid = (pl.cdiv(M, tm),)     # ragged last block is masked by Pallas

        kernel = functools.partial(
            _mlp_softmax_kernel,
            n_layers=len(self.weights),
            n_classes=self.n_classes,
            activation=self.activation,
        )

        operands = [x]
        for w, b in zip(self.weights, self.biases):
            operands += [w, b]

        def build_and_run(single_buffer_weights):
            in_specs = [pl.BlockSpec((tm, K0), lambda i: (i, 0))]
            for w, b in zip(self.weights, self.biases):
                in_specs.append(self._const_spec(w.shape, single_buffer_weights))
                in_specs.append(self._const_spec(b.shape, single_buffer_weights))

            return pl.pallas_call(
                kernel,
                out_shape=jax.ShapeDtypeStruct((M, self.n_classes), jnp.float32),
                grid=grid,
                in_specs=in_specs,
                out_specs=pl.BlockSpec((tm, self.n_classes), lambda i: (i, 0)),
                compiler_params=pltpu.CompilerParams(
                    dimension_semantics=("parallel",),   # batch axis -> v7x megacore
                    vmem_limit_bytes=32 * 1024 * 1024,   # v5e default is only 16 MiB
                ),
            )(*operands)

        try:
            return build_and_run(single_buffer_weights=True)
        except Exception:
            # pl.Buffered(1) (single-buffered invariant operands) not supported
            # by this jax/libtpu build -> fall back to default double-buffering.
            return build_and_run(single_buffer_weights=False)


# ------------------------------ main -----------------------------------------

if __name__ == "__main__":
    key = jax.random.PRNGKey(0)
    key, xkey, pkey = jax.random.split(key, 3)

    sizes = [16, 32, 10]          # input dim 16, one hidden layer of 32, 10 classes
    batch = 8

    model = PTDeepPallas(sizes, pkey)
    x = jax.random.normal(xkey, (batch, sizes[0]), dtype=jnp.float32)

    probs = jax.block_until_ready(model.forward(x))

    # sanity: correct (un-padded) shape, finite, non-negative, rows sum to ~1
    # (exact division now -> tight tolerance).
    assert probs.shape == (batch, sizes[-1])
    assert bool(jnp.all(jnp.isfinite(probs)))
    assert bool(jnp.all(probs >= 0.0))
    row_sums = jnp.sum(probs, axis=1)
    assert bool(jnp.all(jnp.abs(row_sums - 1.0) < 1e-3))

    print("KERNEL_OK")
</pallas_src>

<mosaic_0001>
module attributes {stable_mosaic.version = 11 : i64} {
  func.func @_mlp_softmax_kernel(%arg0: i32, %arg1: memref<8x16xf32, #tpu.memory_space<vmem>>, %arg2: memref<16x128xf32, #tpu.memory_space<vmem>>, %arg3: memref<1x128xf32, #tpu.memory_space<vmem>>, %arg4: memref<128x128xf32, #tpu.memory_space<vmem>>, %arg5: memref<1x128xf32, #tpu.memory_space<vmem>>, %arg6: memref<8x10xf32, #tpu.memory_space<vmem>>) attributes {dimension_semantics = [#tpu.dimension_semantics<parallel>], iteration_bounds = array<i64: 1>, scalar_prefetch = 0 : i64, scratch_operands = 0 : i64, tpu.core_type = #tpu.core_type<tc>, window_params = [{transform_indices = @transform_0, window_bounds = array<i64: 8, 16>}, {pipeline_mode = #tpu.pipeline_mode<synchronous>, transform_indices = @transform_1, window_bounds = array<i64: 16, 128>}, {pipeline_mode = #tpu.pipeline_mode<synchronous>, transform_indices = @transform_2, window_bounds = array<i64: 1, 128>}, {pipeline_mode = #tpu.pipeline_mode<synchronous>, transform_indices = @transform_3, window_bounds = array<i64: 128, 128>}, {pipeline_mode = #tpu.pipeline_mode<synchronous>, transform_indices = @transform_4, window_bounds = array<i64: 1, 128>}, {transform_indices = @transform_5, window_bounds = array<i64: 8, 10>}]} {
    %c0 = arith.constant 0 : index
    %c0_0 = arith.constant 0 : index
    %0 = vector.load %arg1[%c0, %c0_0] : memref<8x16xf32, #tpu.memory_space<vmem>>, vector<8x16xf32>
    %c0_1 = arith.constant 0 : index
    %c0_2 = arith.constant 0 : index
    %1 = vector.load %arg2[%c0_1, %c0_2] : memref<16x128xf32, #tpu.memory_space<vmem>>, vector<16x128xf32>
    %c0_3 = arith.constant 0 : index
    %c0_4 = arith.constant 0 : index
    %2 = vector.load %arg3[%c0_3, %c0_4] : memref<1x128xf32, #tpu.memory_space<vmem>>, vector<1x128xf32>
    %cst = arith.constant dense<0.000000e+00> : vector<8x128xf32>
    %3 = tpu.matmul %0, %1, %cst {dimension_numbers = #tpu.dot_dimension_numbers<[1], [0], [0], [1], [0, 0, 1, 1], [], []>} : vector<8x16xf32>, vector<16x128xf32>, vector<8x128xf32> -> vector<8x128xf32>
    %4 = vector.broadcast %2 : vector<1x128xf32> to vector<8x128xf32>
    %5 = arith.addf %3, %4 : vector<8x128xf32>
    %cst_5 = arith.constant 0.000000e+00 : f32
    %6 = vector.broadcast %cst_5 : f32 to vector<8x128xf32>
    %7 = arith.maximumf %5, %6 : vector<8x128xf32>
    %c0_6 = arith.constant 0 : index
    %c0_7 = arith.constant 0 : index
    %8 = vector.load %arg4[%c0_6, %c0_7] : memref<128x128xf32, #tpu.memory_space<vmem>>, vector<128x128xf32>
    %c0_8 = arith.constant 0 : index
    %c0_9 = arith.constant 0 : index
    %9 = vector.load %arg5[%c0_8, %c0_9] : memref<1x128xf32, #tpu.memory_space<vmem>>, vector<1x128xf32>
    %cst_10 = arith.constant dense<0.000000e+00> : vector<8x128xf32>
    %10 = tpu.matmul %7, %8, %cst_10 {dimension_numbers = #tpu.dot_dimension_numbers<[1], [0], [0], [1], [0, 0, 1, 1], [], []>} : vector<8x128xf32>, vector<128x128xf32>, vector<8x128xf32> -> vector<8x128xf32>
    %11 = vector.broadcast %9 : vector<1x128xf32> to vector<8x128xf32>
    %12 = arith.addf %10, %11 : vector<8x128xf32>
    %cst_11 = arith.constant 0.000000e+00 : f32
    %13 = vector.broadcast %cst_11 : f32 to vector<8x128xf32>
    %14 = arith.maximumf %12, %13 : vector<8x128xf32>
    %15 = vector.extract_strided_slice %14 {offsets = [0, 0], sizes = [8, 10], strides = [1, 1]} : vector<8x128xf32> to vector<8x10xf32>
    %cst_12 = arith.constant dense<0xFF800000> : vector<8xf32>
    %16 = vector.multi_reduction <maximumf>, %15, %cst_12 [1] : vector<8x10xf32> to vector<8xf32>
    %17 = vector.shape_cast %16 : vector<8xf32> to vector<8x1xf32>
    %18 = vector.broadcast %17 : vector<8x1xf32> to vector<8x10xf32>
    %19 = arith.subf %15, %18 : vector<8x10xf32>
    %20 = math.exp %19 : vector<8x10xf32>
    %cst_13 = arith.constant dense<0.000000e+00> : vector<8xf32>
    %21 = vector.multi_reduction <add>, %20, %cst_13 [1] : vector<8x10xf32> to vector<8xf32>
    %22 = vector.shape_cast %21 : vector<8xf32> to vector<8x1xf32>
    %23 = vector.broadcast %22 : vector<8x1xf32> to vector<8x10xf32>
    %24 = arith.divf %20, %23 : vector<8x10xf32>
    %c0_14 = arith.constant 0 : index
    %c0_15 = arith.constant 0 : index
    %25 = vector.load %arg6[%c0_14, %c0_15] : memref<8x10xf32, #tpu.memory_space<vmem>>, vector<8x10xf32>
    tpu.vector_store %arg6[%c0_14, %c0_15], %24 {strides = array<i32>} : memref<8x10xf32, #tpu.memory_space<vmem>>, vector<8x10xf32>,
    return
  }
  func.func @transform_0(%arg0: i32) -> (i32, i32) {
    %c0_i32 = arith.constant 0 : i32
    %c0_i32_0 = arith.constant 0 : i32
    return %arg0, %c0_i32 : i32, i32
  }
  func.func @transform_1(%arg0: i32) -> (i32, i32) {
    %c0_i32 = arith.constant 0 : i32
    %c0_i32_0 = arith.constant 0 : i32
    %c0_i32_1 = arith.constant 0 : i32
    return %c0_i32, %c0_i32_0 : i32, i32
  }
  func.func @transform_2(%arg0: i32) -> (i32, i32) {
    %c0_i32 = arith.constant 0 : i32
    %c0_i32_0 = arith.constant 0 : i32
    %c0_i32_1 = arith.constant 0 : i32
    return %c0_i32, %c0_i32_0 : i32, i32
  }
  func.func @transform_3(%arg0: i32) -> (i32, i32) {
    %c0_i32 = arith.constant 0 : i32
    %c0_i32_0 = arith.constant 0 : i32
    %c0_i32_1 = arith.constant 0 : i32
    return %c0_i32, %c0_i32_0 : i32, i32
  }
  func.func @transform_4(%arg0: i32) -> (i32, i32) {
    %c0_i32 = arith.constant 0 : i32
    %c0_i32_0 = arith.constant 0 : i32
    %c0_i32_1 = arith.constant 0 : i32
    return %c0_i32, %c0_i32_0 : i32, i32
  }
  func.func @transform_5(%arg0: i32) -> (i32, i32) {
    %c0_i32 = arith.constant 0 : i32
    %c0_i32_0 = arith.constant 0 : i32
    return %arg0, %c0_i32 : i32, i32
  }
}

module attributes {stable_mosaic.version = 11 : i64} {
  func.func @_mlp_softmax_kernel(%arg0: i32, %arg1: memref<8x16xf32, #tpu.memory_space<vmem>>, %arg2: memref<16x128xf32, #tpu.memory_space<vmem>>, %arg3: memref<1x128xf32, #tpu.memory_space<vmem>>, %arg4: memref<128x128xf32, #tpu.memory_space<vmem>>, %arg5: memref<1x128xf32, #tpu.memory_space<vmem>>, %arg6: memref<8x10xf32, #tpu.memory_space<vmem>>) attributes {dimension_semantics = [#tpu.dimension_semantics<parallel>], iteration_bounds = array<i64: 1>, scalar_prefetch = 0 : i64, scratch_operands = 0 : i64, tpu.core_type = #tpu.core_type<tc>, window_params = [{transform_indices = @transform_0, window_bounds = array<i64: 8, 16>}, {pipeline_mode = #tpu.pipeline_mode<synchronous>, transform_indices = @transform_1, window_bounds = array<i64: 16, 128>}, {pipeline_mode = #tpu.pipeline_mode<synchronous>, transform_indices = @transform_2, window_bounds = array<i64: 1, 128>}, {pipeline_mode = #tpu.pipeline_mode<synchronous>, transform_indices = @transform_3, window_bounds = array<i64: 128, 128>}, {pipeline_mode = #tpu.pipeline_mode<synchronous>, transform_indices = @transform_4, window_bounds = array<i64: 1, 128>}, {transform_indices = @transform_5, window_bounds = array<i64: 8, 10>}]} {
    %c0 = arith.constant 0 : index
    %c0_0 = arith.constant 0 : index
    %0 = vector.load %arg1[%c0, %c0_0] : memref<8x16xf32, #tpu.memory_space<vmem>>, vector<8x16xf32>
    %c0_1 = arith.constant 0 : index
    %c0_2 = arith.constant 0 : index
    %1 = vector.load %arg2[%c0_1, %c0_2] : memref<16x128xf32, #tpu.memory_space<vmem>>, vector<16x128xf32>
    %c0_3 = arith.constant 0 : index
    %c0_4 = arith.constant 0 : index
    %2 = vector.load %arg3[%c0_3, %c0_4] : memref<1x128xf32, #tpu.memory_space<vmem>>, vector<1x128xf32>
    %cst = arith.constant dense<0.000000e+00> : vector<8x128xf32>
    %3 = tpu.matmul %0, %1, %cst {dimension_numbers = #tpu.dot_dimension_numbers<[1], [0], [0], [1], [0, 0, 1, 1], [], []>} : vector<8x16xf32>, vector<16x128xf32>, vector<8x128xf32> -> vector<8x128xf32>
    %4 = vector.broadcast %2 : vector<1x128xf32> to vector<8x128xf32>
    %5 = arith.addf %3, %4 : vector<8x128xf32>
    %cst_5 = arith.constant 0.000000e+00 : f32
    %6 = vector.broadcast %cst_5 : f32 to vector<8x128xf32>
    %7 = arith.maximumf %5, %6 : vector<8x128xf32>
    %c0_6 = arith.constant 0 : index
    %c0_7 = arith.constant 0 : index
    %8 = vector.load %arg4[%c0_6, %c0_7] : memref<128x128xf32, #tpu.memory_space<vmem>>, vector<128x128xf32>
    %c0_8 = arith.constant 0 : index
    %c0_9 = arith.constant 0 : index
    %9 = vector.load %arg5[%c0_8, %c0_9] : memref<1x128xf32, #tpu.memory_space<vmem>>, vector<1x128xf32>
    %cst_10 = arith.constant dense<0.000000e+00> : vector<8x128xf32>
    %10 = tpu.matmul %7, %8, %cst_10 {dimension_numbers = #tpu.dot_dimension_numbers<[1], [0], [0], [1], [0, 0, 1, 1], [], []>} : vector<8x128xf32>, vector<128x128xf32>, vector<8x128xf32> -> vector<8x128xf32>
    %11 = vector.broadcast %9 : vector<1x128xf32> to vector<8x128xf32>
    %12 = arith.addf %10, %11 : vector<8x128xf32>
    %cst_11 = arith.constant 0.000000e+00 : f32
    %13 = vector.broadcast %cst_11 : f32 to vector<8x128xf32>
    %14 = arith.maximumf %12, %13 : vector<8x128xf32>
    %15 = vector.extract_strided_slice %14 {offsets = [0, 0], sizes = [8, 10], strides = [1, 1]} : vector<8x128xf32> to vector<8x10xf32>
    %cst_12 = arith.constant dense<0xFF800000> : vector<8xf32>
    %16 = vector.multi_reduction <maximumf>, %15, %cst_12 [1] : vector<8x10xf32> to vector<8xf32>
    %17 = vector.shape_cast %16 : vector<8xf32> to vector<8x1xf32>
    %18 = vector.broadcast %17 : vector<8x1xf32> to vector<8x10xf32>
    %19 = arith.subf %15, %18 : vector<8x10xf32>
    %20 = math.exp %19 : vector<8x10xf32>
    %cst_13 = arith.constant dense<0.000000e+00> : vector<8xf32>
    %21 = vector.multi_reduction <add>, %20, %cst_13 [1] : vector<8x10xf32> to vector<8xf32>
    %22 = vector.shape_cast %21 : vector<8xf32> to vector<8x1xf32>
    %23 = vector.broadcast %22 : vector<8x1xf32> to vector<8x10xf32>
    %24 = arith.divf %20, %23 : vector<8x10xf32>
    %c0_14 = arith.constant 0 : index
    %c0_15 = arith.constant 0 : index
    %25 = vector.load %arg6[%c0_14, %c0_15] : memref<8x10xf32, #tpu.memory_space<vmem>>, vector<8x10xf32>
    tpu.vector_store %arg6[%c0_14, %c0_15], %24 {strides = array<i32>} : memref<8x10xf32, #tpu.memory_space<vmem>>, vector<8x10xf32>,
    return
  }
  func.func @transform_0(%arg0: i32) -> (i32, i32) {
    %c0_i32 = arith.constant 0 : i32
    %c0_i32_0 = arith.constant 0 : i32
    return %arg0, %c0_i32 : i32, i32
  }
  func.func @transform_1(%arg0: i32) -> (i32, i32) {
    %c0_i32 = arith.constant 0 : i32
    %c0_i32_0 = arith.constant 0 : i32
    %c0_i32_1 = arith.constant 0 : i32
    return %c0_i32, %c0_i32_0 : i32, i32
  }
  func.func @transform_2(%arg0: i32) -> (i32, i32) {
    %c0_i32 = arith.constant 0 : i32
    %c0_i32_0 = arith.constant 0 : i32
    %c0_i32_1 = arith.constant 0 : i32
    return %c0_i32, %c0_i32_0 : i32, i32
  }
  func.func @transform_3(%arg0: i32) -> (i32, i32) {
    %c0_i32 = arith.constant 0 : i32
    %c0_i32_0 = arith.constant 0 : i32
    %c0_i32_1 = arith.constant 0 : i32
    return %c0_i32, %c0_i32_0 : i32, i32
  }
  func.func @transform_4(%arg0: i32) -> (i32, i32) {
    %c0_i32 = arith.constant 0 : i32
    %c0_i32_0 = arith.constant 0 : i32
    %c0_i32_1 = arith.constant 0 : i32
    return %c0_i32, %c0_i32_0 : i32, i32
  }
  func.func @transform_5(%arg0: i32) -> (i32, i32) {
    %c0_i32 = arith.constant 0 : i32
    %c0_i32_0 = arith.constant 0 : i32
    return %arg0, %c0_i32 : i32, i32
  }
}

</mosaic_0001>

<bundles_post_ra>
// kernel: tpu_custom_call.1
= control target key start
LH: loop header
LB: loop body
LE: loop exit
PB: predicated region body
PF: predicated region fallthrough
CT: control target
= control target key end

     0   :  { %10 = vsyncpa [#allocation3], 0  ;;  %s490_s0 = inlined_call_operand.hbm [shape: f32[8,16], index: 0, kind: input, shape index: {}]   ;;  %s491_s1 = inlined_call_operand.hbm [shape: f32[16,128], index: 1, kind: input, shape index: {}]   ;;  %s492_s2 = inlined_call_operand.vmem [shape: f32[1,128], index: 2, kind: input, shape index: {}]   ;;  %s493_s3 = inlined_call_operand.hbm [shape: f32[128,128], index: 3, kind: input, shape index: {}]   ;;  %s494_s4 = inlined_call_operand.vmem [shape: f32[1,128], index: 4, kind: input, shape index: {}]   ;;  %s495_s5 = inlined_call_operand.hbm [shape: f32[8,10], index: 5, kind: output, shape index: {}]  }
   0x1   :  { %11 = vsyncpa [#allocation6], 0 }
   0x2   :  { %12 = vsyncpa [#allocation4], 0  ;;  %s431_s18 = smov [#allocation5]  }
   0x3   :  { %s28_s19 = sshll.u32 %s431_s18, 4  ;;  %s29_s19 = int_to_ptr.vmem [resolvable:$true] %s28_s19 }
   0x4   :  { %s353_s20 = scalar_lea.vmem %s29_s19, 256  ;;  %p358_p1 = scmp.lt.s32.totalorder %s29_s19, %s29_s19 }
   0x5   :  { %p354_p0 = scmp.ne.s32.totalorder %s29_s19, %s353_s20  ;;  %p359_p2 = scmp.lt.s32.totalorder %s353_s20, %s353_s20 }
   0x7   :  { %p360_p3 = por %p359_p2, %p358_p1 }
   0x9   :  { %p361_p4 = pnand %p360_p3, %p354_p0 }
   0xb   :  { %364 = shalt.err (!%p361_p4)
}
   0xc   :  { %s432_s21 = smov 128   ;;  %s433_s22 = smov 8  }
   0xd   :  { %34 = dma.hbm_to_vmem [thread:$0]  %s491_s1, 256, %s29_s19, [#allocation6], %s432_s21, %s432_s21, %s433_s22  }
   0xe   :  { %s434_s25 = smov [#allocation2]   ;;  %s435_s27 = smov [#allocation7]  }
   0xf   :  { %s19_s26 = sshll.u32 %s434_s25, 4  ;;  %s42_s28 = sshll.u32 %s435_s27, 4  ;;  %s20_s26 = int_to_ptr.vmem [resolvable:$true] %s19_s26  ;;  %s43_s28 = int_to_ptr.vmem [resolvable:$true] %s42_s28 }
  0x10   :  { %s373_s29 = scalar_lea.vmem %s20_s26, 128  ;;  %p378_p6 = scmp.lt.s32.totalorder %s20_s26, %s20_s26 }
  0x11   :  { %p374_p5 = scmp.ne.s32.totalorder %s20_s26, %s373_s29  ;;  %p379_p7 = scmp.lt.s32.totalorder %s373_s29, %s373_s29 }
  0x13   :  { %p380_p8 = por %p379_p7, %p378_p6 }
  0x15   :  { %p381_p9 = pnand %p380_p8, %p374_p5 }
  0x17   :  { %384 = shalt.err (!%p381_p9)
}
  0x18   :  { %22 = dma.hbm_to_vmem [thread:$0]  %s490_s0, 128, %s20_s26, [#allocation3]  }
  0x19   :  { %s393_s7 = scalar_lea.vmem %s43_s28, 2048  ;;  %p398_p11 = scmp.lt.s32.totalorder %s43_s28, %s43_s28 }
  0x1a   :  { %p394_p10 = scmp.ne.s32.totalorder %s43_s28, %s393_s7  ;;  %p399_p12 = scmp.lt.s32.totalorder %s393_s7, %s393_s7 }
  0x1c   :  { %p400_p13 = por %p399_p12, %p398_p11 }
  0x1e   :  { %p401_p0 = pnand %p400_p13, %p394_p10 }
  0x20   :  { %404 = shalt.err (!%p401_p0)
}
  0x21   :  { %48 = dma.hbm_to_vmem [thread:$0]  %s493_s3, 2048, %s43_s28, [#allocation6], %s432_s21, %s432_s21, %s433_s22  }
  0x22   :  { %425 = dma.done.wait [#allocation3], 128  }
  0x23   :  { %426 = vsyncadd [#allocation3], 4294967168 }
  0x24   :  { %427 = dma.done.wait [#allocation6], 2304  }
  0x25   :  { %428 = vsyncadd [#allocation6], 4294964992  ;;  %v436_v0 = vmov 0.0   ;;  %vm437_vm0 = vmmov 0   ;;  %v62_v1 = vld [vmem:[#allocation5 + $0x8] sm:$0xff]  ;;  %v61_v2 = vld [vmem:[#allocation5] sm:$0xff] }
  0x26   :  { %291 = vmatprep.subr.mxu0 %v436_v0  ;;  %295 = vmatprep.mubr.msk.f32.mxu0 %vm437_vm0, %v436_v0  ;;  %v60_v3 = vld [vmem:[#allocation2] sm:$0xff]  ;;  %vm70_vm1 = vcmask 130048   ;;  %v160_v4 = vld [vmem:[#allocation7 + $0x78] sm:$0xff]  ;;  %v159_v5 = vld [vmem:[#allocation7 + $0x70] sm:$0xff]  ;;  %vm239_vm2 = vcmask 80896  }
  0x27   :  { %298 = vmatprep.subr.mxu1 %v436_v0  ;;  %330 = vmatprep.mubr.msk.f32.mxu1 %vm437_vm0, %v436_v0  ;;  %v158_v6 = vld [vmem:[#allocation7 + $0x68] sm:$0xff]  ;;  %v157_v7 = vld [vmem:[#allocation7 + $0x60] sm:$0xff]  ;;  %v156_v8 = vld [vmem:[#allocation7 + $0x58] sm:$0xff] }
  0x28   :  { %292 = vmatpush3.msra.mxu0 %v62_v1  ;;  %299 = vmatpush3.msra.mxu1 %v160_v4  ;;  %v155_v9 = vld [vmem:[#allocation7 + $0x50] sm:$0xff]  ;;  %v154_v10 = vld [vmem:[#allocation7 + $0x48] sm:$0xff]  ;;  %v153_v11 = vld [vmem:[#allocation7 + $0x40] sm:$0xff] }
  0x29   :  { %293 = vmatprep.subr.mxu0 %v436_v0  ;;  %300 = vmatprep.subr.mxu1 %v436_v0  ;;  %v152_v12 = vld [vmem:[#allocation7 + $0x38] sm:$0xff]  ;;  %v151_v13 = vld [vmem:[#allocation7 + $0x30] sm:$0xff]  ;;  %v150_v14 = vld [vmem:[#allocation7 + $0x28] sm:$0xff] }
  0x2a   :  { %294 = vmatpush3.msra.mxu0 %v61_v2  ;;  %301 = vmatpush3.msra.mxu1 %v159_v5  ;;  %v149_v15 = vld [vmem:[#allocation7 + $0x20] sm:$0xff]  ;;  %v148_v16 = vld [vmem:[#allocation7 + $0x18] sm:$0xff]  ;;  %v147_v17 = vld [vmem:[#allocation7 + $0x10] sm:$0xff] }
  0x2b   :  { %296 = vmatmul.mubr.msk.f32.vlgmr.msra.gmra.mxu0 %vm70_vm1, %v60_v3  ;;  %302 = vmatprep.subr.mxu1 %v436_v0  ;;  %v146_v18 = vld [vmem:[#allocation7 + $0x8] sm:$0xff]  ;;  %v145_v19 = vld [vmem:[#allocation7] sm:$0xff] }
  0x2c   :  { %303 = vmatpush3.msra.mxu1 %v158_v6  ;;  %v268_v20 = vld [vmem:[%s492_s2] ss:$0 sm:$0xff]  ;;  %s438_s2 = smov [#allocation8]  }
  0x2d   :  { %304 = vmatprep.subr.mxu1 %v436_v0  ;;  %v270_v25 = vld [vmem:[%s494_s4] ss:$0 sm:$0xff]  ;;  %s258_s4 = sshll.u32 %s438_s2, 4  ;;  %s259_s4 = int_to_ptr.vmem [resolvable:$true] %s258_s4 }
  0x2e   :  { %305 = vmatpush3.msra.mxu1 %v157_v7  ;;  %s405_s11 = scalar_lea.vmem %s259_s4, 128  ;;  %p410_p2 = scmp.lt.s32.totalorder %s259_s4, %s259_s4 }
  0x2f   :  { %306 = vmatprep.subr.mxu1 %v436_v0  ;;  %p406_p1 = scmp.ne.s32.totalorder %s259_s4, %s405_s11  ;;  %p411_p3 = scmp.lt.s32.totalorder %s405_s11, %s405_s11 }
  0x30   :  { %307 = vmatpush3.msra.mxu1 %v156_v8 }
  0x31   :  { %308 = vmatprep.subr.mxu1 %v436_v0  ;;  %p412_p4 = por %p411_p3, %p410_p2 }
  0x32   :  { %309 = vmatpush3.msra.mxu1 %v155_v9 }
  0x33   :  { %310 = vmatprep.subr.mxu1 %v436_v0  ;;  %p413_p5 = pnand %p412_p4, %p406_p1 }
  0x34   :  { %311 = vmatpush3.msra.mxu1 %v154_v10 }
  0x35   :  { %312 = vmatprep.subr.mxu1 %v436_v0 }
  0x36   :  { %313 = vmatpush3.msra.mxu1 %v153_v11 }
  0x37   :  { %314 = vmatprep.subr.mxu1 %v436_v0 }
  0x38   :  { %315 = vmatpush3.msra.mxu1 %v152_v12 }
  0x39   :  { %316 = vmatprep.subr.mxu1 %v436_v0 }
  0x3a   :  { %317 = vmatpush3.msra.mxu1 %v151_v13 }
  0x3b   :  { %318 = vmatprep.subr.mxu1 %v436_v0 }
  0x3c   :  { %319 = vmatpush3.msra.mxu1 %v150_v14 }
  0x3d   :  { %320 = vmatprep.subr.mxu1 %v436_v0 }
  0x3e   :  { %321 = vmatpush3.msra.mxu1 %v149_v15 }
  0x3f   :  { %322 = vmatprep.subr.mxu1 %v436_v0 }
  0x40   :  { %323 = vmatpush3.msra.mxu1 %v148_v16 }
  0x41   :  { %324 = vmatprep.subr.mxu1 %v436_v0 }
  0x42   :  { %325 = vmatpush3.msra.mxu1 %v147_v17 }
  0x43   :  { %326 = vmatprep.subr.mxu1 %v436_v0 }
  0x44   :  { %327 = vmatpush3.msra.mxu1 %v146_v18 }
  0x45   :  { %328 = vmatprep.subr.mxu1 %v436_v0 }
  0x46   :  { %329 = vmatpush3.msra.mxu1 %v145_v19 }
  0xeb   :  { %v140_v21 = vpop.f32.mrf.mxu0 }
  0xec   :  { %v141_v22 = vadd.f32 %v268_v20, %v140_v21 }
  0xed   :  { %v297_v23 = vpop.f32.mrf.mxu0 }
  0xee   :  { %v144_v24 = vmax.f32 %v141_v22, 0.0 }
  0xf0   :  { %331 = vmatmul.mubr.f32.vlgmr.msra.gmra.mxu1 %v144_v24 }
 0x1b0   :  { %v234_v26 = vpop.f32.mrf.mxu1 }
 0x1b1   :  { %v235_v27 = vadd.f32 %v270_v25, %v234_v26 }
 0x1b2   :  { %v332_v28 = vpop.f32.mrf.mxu1 }
 0x1b3   :  { %v238_v29 = vmax.f32 %v235_v27, 0.0 }
 0x1b5   :  { %v240_v30 = vsel %vm239_vm2, %v238_v29, -inf }
 0x1b6   :  { %241 = vmax.xlane.f32.xlu0 %v240_v30 }
 0x23f   :  { %v242_v31 = vpop.xlane.xlu0 %241 }
 0x240   :  { %v243_v32 = vsub.f32 %v238_v29, %v242_v31 }
 0x242   :  { %v244_v33 = vmul.f32 1.442695, %v243_v32 }
 0x244   :  { %341 = vpow2.f32 %v244_v33 }
 0x251   :  { %v342_v34 = vpop.eup %341 }
 0x252   :  { %v246_v35 = vsel %vm239_vm2, %v342_v34, 0.0 }
 0x253   :  { %247 = vadd.xlane.f32.xlu0 %v246_v35 }
 0x2dc   :  { %v248_v36 = vpop.xlane.xlu0 %247 }
 0x2dd   :  { %343 = vrcp.f32 %v248_v36 }
 0x2ea   :  { %v344_v37 = vpop.eup %343 }
 0x2eb   :  { %v250_v38 = vmul.f32 %v344_v37, %v342_v34 }
 0x2ed   :  { %251 = vst.msk [vmem:[#allocation8] sm:$0xff] %vm239_vm2, %v250_v38 }
 0x2ee   :  { %416 = shalt.err (!%p413_p5)
}
 0x2ef   :  { %261 = dma.vmem_to_hbm [thread:$0]  %s259_s4, 128, %s495_s5, [#allocation4]  }
 0x2f0   :  { %429 = dma.done.wait [#allocation4], 128  }
 0x2f1   :  { %430 = vsyncadd [#allocation4], 4294967168 }
 0x2f2   :  { %265 = vsyncpa [#allocation3], 1 }
 0x2f3   :  { %266 = vsyncpa [#allocation6], 1 }
 0x2f4   :  { %267 = vsyncpa [#allocation4], 1 }

// kernel: tpu_custom_call.1
= control target key start
LH: loop header
LB: loop body
LE: loop exit
PB: predicated region body
PF: predicated region fallthrough
CT: control target
= control target key end

     0   :  { %10 = vsyncpa [#allocation3], 0  ;;  %s490_s0 = inlined_call_operand.hbm [shape: f32[8,16], index: 0, kind: input, shape index: {}]   ;;  %s491_s1 = inlined_call_operand.hbm [shape: f32[16,128], index: 1, kind: input, shape index: {}]   ;;  %s492_s2 = inlined_call_operand.vmem [shape: f32[1,128], index: 2, kind: input, shape index: {}]   ;;  %s493_s3 = inlined_call_operand.hbm [shape: f32[128,128], index: 3, kind: input, shape index: {}]   ;;  %s494_s4 = inlined_call_operand.vmem [shape: f32[1,128], index: 4, kind: input, shape index: {}]   ;;  %s495_s5 = inlined_call_operand.hbm [shape: f32[8,10], index: 5, kind: output, shape index: {}]  }
   0x1   :  { %11 = vsyncpa [#allocation6], 0 }
   0x2   :  { %12 = vsyncpa [#allocation4], 0  ;;  %s431_s18 = smov [#allocation5]  }
   0x3   :  { %s28_s19 = sshll.u32 %s431_s18, 4  ;;  %s29_s19 = int_to_ptr.vmem [resolvable:$true] %s28_s19 }
   0x4   :  { %s353_s20 = scalar_lea.vmem %s29_s19, 256  ;;  %p358_p1 = scmp.lt.s32.totalorder %s29_s19, %s29_s19 }
   0x5   :  { %p354_p0 = scmp.ne.s32.totalorder %s29_s19, %s353_s20  ;;  %p359_p2 = scmp.lt.s32.totalorder %s353_s20, %s353_s20 }
   0x7   :  { %p360_p3 = por %p359_p2, %p358_p1 }
   0x9   :  { %p361_p4 = pnand %p360_p3, %p354_p0 }
   0xb   :  { %364 = shalt.err (!%p361_p4)
}
   0xc   :  { %s432_s21 = smov 128   ;;  %s433_s22 = smov 8  }
   0xd   :  { %34 = dma.hbm_to_vmem [thread:$0]  %s491_s1, 256, %s29_s19, [#allocation6], %s432_s21, %s432_s21, %s433_s22  }
   0xe   :  { %s434_s25 = smov [#allocation2]   ;;  %s435_s27 = smov [#allocation7]  }
   0xf   :  { %s19_s26 = sshll.u32 %s434_s25, 4  ;;  %s42_s28 = sshll.u32 %s435_s27, 4  ;;  %s20_s26 = int_to_ptr.vmem [resolvable:$true] %s19_s26  ;;  %s43_s28 = int_to_ptr.vmem [resolvable:$true] %s42_s28 }
  0x10   :  { %s373_s29 = scalar_lea.vmem %s20_s26, 128  ;;  %p378_p6 = scmp.lt.s32.totalorder %s20_s26, %s20_s26 }
  0x11   :  { %p374_p5 = scmp.ne.s32.totalorder %s20_s26, %s373_s29  ;;  %p379_p7 = scmp.lt.s32.totalorder %s373_s29, %s373_s29 }
  0x13   :  { %p380_p8 = por %p379_p7, %p378_p6 }
  0x15   :  { %p381_p9 = pnand %p380_p8, %p374_p5 }
  0x17   :  { %384 = shalt.err (!%p381_p9)
}
  0x18   :  { %22 = dma.hbm_to_vmem [thread:$0]  %s490_s0, 128, %s20_s26, [#allocation3]  }
  0x19   :  { %s393_s7 = scalar_lea.vmem %s43_s28, 2048  ;;  %p398_p11 = scmp.lt.s32.totalorder %s43_s28, %s43_s28 }
  0x1a   :  { %p394_p10 = scmp.ne.s32.totalorder %s43_s28, %s393_s7  ;;  %p399_p12 = scmp.lt.s32.totalorder %s393_s7, %s393_s7 }
  0x1c   :  { %p400_p13 = por %p399_p12, %p398_p11 }
  0x1e   :  { %p401_p0 = pnand %p400_p13, %p394_p10 }
  0x20   :  { %404 = shalt.err (!%p401_p0)
}
  0x21   :  { %48 = dma.hbm_to_vmem [thread:$0]  %s493_s3, 2048, %s43_s28, [#allocation6], %s432_s21, %s432_s21, %s433_s22  }
  0x22   :  { %425 = dma.done.wait [#allocation3], 128  }
  0x23   :  { %426 = vsyncadd [#allocation3], 4294967168 }
  0x24   :  { %427 = dma.done.wait [#allocation6], 2304  }
  0x25   :  { %428 = vsyncadd [#allocation6], 4294964992  ;;  %v436_v0 = vmov 0.0   ;;  %vm437_vm0 = vmmov 0   ;;  %v62_v1 = vld [vmem:[#allocation5 + $0x8] sm:$0xff]  ;;  %v61_v2 = vld [vmem:[#allocation5] sm:$0xff] }
  0x26   :  { %291 = vmatprep.subr.mxu0 %v436_v0  ;;  %295 = vmatprep.mubr.msk.f32.mxu0 %vm437_vm0, %v436_v0  ;;  %v60_v3 = vld [vmem:[#allocation2] sm:$0xff]  ;;  %vm70_vm1 = vcmask 130048   ;;  %v160_v4 = vld [vmem:[#allocation7 + $0x78] sm:$0xff]  ;;  %v159_v5 = vld [vmem:[#allocation7 + $0x70] sm:$0xff]  ;;  %vm239_vm2 = vcmask 80896  }
  0x27   :  { %298 = vmatprep.subr.mxu1 %v436_v0  ;;  %330 = vmatprep.mubr.msk.f32.mxu1 %vm437_vm0, %v436_v0  ;;  %v158_v6 = vld [vmem:[#allocation7 + $0x68] sm:$0xff]  ;;  %v157_v7 = vld [vmem:[#allocation7 + $0x60] sm:$0xff]  ;;  %v156_v8 = vld [vmem:[#allocation7 + $0x58] sm:$0xff] }
  0x28   :  { %292 = vmatpush3.msra.mxu0 %v62_v1  ;;  %299 = vmatpush3.msra.mxu1 %v160_v4  ;;  %v155_v9 = vld [vmem:[#allocation7 + $0x50] sm:$0xff]  ;;  %v154_v10 = vld [vmem:[#allocation7 + $0x48] sm:$0xff]  ;;  %v153_v11 = vld [vmem:[#allocation7 + $0x40] sm:$0xff] }
  0x29   :  { %293 = vmatprep.subr.mxu0 %v436_v0  ;;  %300 = vmatprep.subr.mxu1 %v436_v0  ;;  %v152_v12 = vld [vmem:[#allocation7 + $0x38] sm:$0xff]  ;;  %v151_v13 = vld [vmem:[#allocation7 + $0x30] sm:$0xff]  ;;  %v150_v14 = vld [vmem:[#allocation7 + $0x28] sm:$0xff] }
  0x2a   :  { %294 = vmatpush3.msra.mxu0 %v61_v2  ;;  %301 = vmatpush3.msra.mxu1 %v159_v5  ;;  %v149_v15 = vld [vmem:[#allocation7 + $0x20] sm:$0xff]  ;;  %v148_v16 = vld [vmem:[#allocation7 + $0x18] sm:$0xff]  ;;  %v147_v17 = vld [vmem:[#allocation7 + $0x10] sm:$0xff] }
  0x2b   :  { %296 = vmatmul.mubr.msk.f32.vlgmr.msra.gmra.mxu0 %vm70_vm1, %v60_v3  ;;  %302 = vmatprep.subr.mxu1 %v436_v0  ;;  %v146_v18 = vld [vmem:[#allocation7 + $0x8] sm:$0xff]  ;;  %v145_v19 = vld [vmem:[#allocation7] sm:$0xff] }
  0x2c   :  { %303 = vmatpush3.msra.mxu1 %v158_v6  ;;  %v268_v20 = vld [vmem:[%s492_s2] ss:$0 sm:$0xff]  ;;  %s438_s2 = smov [#allocation8]  }
  0x2d   :  { %304 = vmatprep.subr.mxu1 %v436_v0  ;;  %v270_v25 = vld [vmem:[%s494_s4] ss:$0 sm:$0xff]  ;;  %s258_s4 = sshll.u32 %s438_s2, 4  ;;  %s259_s4 = int_to_ptr.vmem [resolvable:$true] %s258_s4 }
  0x2e   :  { %305 = vmatpush3.msra.mxu1 %v157_v7  ;;  %s405_s11 = scalar_lea.vmem %s259_s4, 128  ;;  %p410_p2 = scmp.lt.s32.totalorder %s259_s4, %s259_s4 }
  0x2f   :  { %306 = vmatprep.subr.mxu1 %v436_v0  ;;  %p406_p1 = scmp.ne.s32.totalorder %s259_s4, %s405_s11  ;;  %p411_p3 = scmp.lt.s32.totalorder %s405_s11, %s405_s11 }
  0x30   :  { %307 = vmatpush3.msra.mxu1 %v156_v8 }
  0x31   :  { %308 = vmatprep.subr.mxu1 %v436_v0  ;;  %p412_p4 = por %p411_p3, %p410_p2 }
  0x32   :  { %309 = vmatpush3.msra.mxu1 %v155_v9 }
  0x33   :  { %310 = vmatprep.subr.mxu1 %v436_v0  ;;  %p413_p5 = pnand %p412_p4, %p406_p1 }
  0x34   :  { %311 = vmatpush3.msra.mxu1 %v154_v10 }
  0x35   :  { %312 = vmatprep.subr.mxu1 %v436_v0 }
  0x36   :  { %313 = vmatpush3.msra.mxu1 %v153_v11 }
  0x37   :  { %314 = vmatprep.subr.mxu1 %v436_v0 }
  0x38   :  { %315 = vmatpush3.msra.mxu1 %v152_v12 }
  0x39   :  { %316 = vmatprep.subr.mxu1 %v436_v0 }
  0x3a   :  { %317 = vmatpush3.msra.mxu1 %v151_v13 }
  0x3b   :  { %318 = vmatprep.subr.mxu1 %v436_v0 }
  0x3c   :  { %319 = vmatpush3.msra.mxu1 %v150_v14 }
  0x3d   :  { %320 = vmatprep.subr.mxu1 %v436_v0 }
  0x3e   :  { %321 = vmatpush3.msra.mxu1 %v149_v15 }
  0x3f   :  { %322 = vmatprep.subr.mxu1 %v436_v0 }
  0x40   :  { %323 = vmatpush3.msra.mxu1 %v148_v16 }
  0x41   :  { %324 = vmatprep.subr.mxu1 %v436_v0 }
  0x42   :  { %325 = vmatpush3.msra.mxu1 %v147_v17 }
  0x43   :  { %326 = vmatprep.subr.mxu1 %v436_v0 }
  0x44   :  { %327 = vmatpush3.msra.mxu1 %v146_v18 }
  0x45   :  { %328 = vmatprep.subr.mxu1 %v436_v0 }
  0x46   :  { %329 = vmatpush3.msra.mxu1 %v145_v19 }
  0xeb   :  { %v140_v21 = vpop.f32.mrf.mxu0 }
  0xec   :  { %v141_v22 = vadd.f32 %v268_v20, %v140_v21 }
  0xed   :  { %v297_v23 = vpop.f32.mrf.mxu0 }
  0xee   :  { %v144_v24 = vmax.f32 %v141_v22, 0.0 }
  0xf0   :  { %331 = vmatmul.mubr.f32.vlgmr.msra.gmra.mxu1 %v144_v24 }
 0x1b0   :  { %v234_v26 = vpop.f32.mrf.mxu1 }
 0x1b1   :  { %v235_v27 = vadd.f32 %v270_v25, %v234_v26 }
 0x1b2   :  { %v332_v28 = vpop.f32.mrf.mxu1 }
 0x1b3   :  { %v238_v29 = vmax.f32 %v235_v27, 0.0 }
 0x1b5   :  { %v240_v30 = vsel %vm239_vm2, %v238_v29, -inf }
 0x1b6   :  { %241 = vmax.xlane.f32.xlu0 %v240_v30 }
 0x23f   :  { %v242_v31 = vpop.xlane.xlu0 %241 }
 0x240   :  { %v243_v32 = vsub.f32 %v238_v29, %v242_v31 }
 0x242   :  { %v244_v33 = vmul.f32 1.442695, %v243_v32 }
 0x244   :  { %341 = vpow2.f32 %v244_v33 }
 0x251   :  { %v342_v34 = vpop.eup %341 }
 0x252   :  { %v246_v35 = vsel %vm239_vm2, %v342_v34, 0.0 }
 0x253   :  { %247 = vadd.xlane.f32.xlu0 %v246_v35 }
 0x2dc   :  { %v248_v36 = vpop.xlane.xlu0 %247 }
 0x2dd   :  { %343 = vrcp.f32 %v248_v36 }
 0x2ea   :  { %v344_v37 = vpop.eup %343 }
 0x2eb   :  { %v250_v38 = vmul.f32 %v344_v37, %v342_v34 }
 0x2ed   :  { %251 = vst.msk [vmem:[#allocation8] sm:$0xff] %vm239_vm2, %v250_v38 }
 0x2ee   :  { %416 = shalt.err (!%p413_p5)
}
 0x2ef   :  { %261 = dma.vmem_to_hbm [thread:$0]  %s259_s4, 128, %s495_s5, [#allocation4]  }
 0x2f0   :  { %429 = dma.done.wait [#allocation4], 128  }
 0x2f1   :  { %430 = vsyncadd [#allocation4], 4294967168 }
 0x2f2   :  { %265 = vsyncpa [#allocation3], 1 }
 0x2f3   :  { %266 = vsyncpa [#allocation6], 1 }
 0x2f4   :  { %267 = vsyncpa [#allocation4], 1 }

</bundles_post_ra>
